<compile_context>
chip_gen: v7x
topology: tpu7x:2x2x1
jax: 0.10.0
libtpu: 0.0.40
codegen_flags: <defaults>
</compile_context>

<pallas_src>
import numpy as np
import jax
import jax.numpy as jnp
from jax.experimental import pallas as pl
from jax.experimental.pallas import tpu as pltpu


def fn_net_kernel(xT_ref, w_in_ref, b_in_ref, w_fc1_ref, b_fc1_ref,
                  w_out_ref, b_out_ref, oT_ref):
    xT = xT_ref[...]                       # (Din, tile_b) f32, batch on lanes
    din = xT_ref.shape[0]
    hp = jax.lax.Precision.HIGHEST

    # Layer 1: K = Din (tiny) contraction as Din broadcast FMAs on the VPU,
    # bias folded into the accumulator init.  (H,1)*(1,tile_b) -> (H,tile_b).
    acc = b_in_ref[...] + w_in_ref[:, 0:1] * xT[0:1, :]
    for k in range(1, din):                # Din is tiny & static
        acc = acc + w_in_ref[:, k:k + 1] * xT[k:k + 1, :]
    h = jnp.tanh(acc)                      # (H, tile_b), lane-dense

    # Layer 2: (H,H) @ (H,tile_b) on the MXU, exact f32.
    h = jnp.dot(w_fc1_ref[...], h,
                preferred_element_type=jnp.float32, precision=hp)
    h = jnp.tanh(h + b_fc1_ref[...])

    # Layer 3: (Dpad,H) @ (H,tile_b) -> lane-dense (Dpad, tile_b) output block.
    y = jnp.dot(w_out_ref[...], h,
                preferred_element_type=jnp.float32, precision=hp)
    oT_ref[...] = (y + b_out_ref[...]).astype(oT_ref.dtype)


def prepare_params(params, *, sublane=8):
    """One-time, batch-independent prep: torch-layout params -> kernel params.

    Keeps weights in PyTorch (out_features, in_features) layout (that is the
    natural layout for the transposed/batch-on-lanes kernel), turns biases
    into column vectors, and zero-pads the output layer to 8 sublanes.
    """
    W_out, b_out = params["w_out"], params["b_out"]
    d_out, _ = W_out.shape
    d_pad = pl.cdiv(d_out, sublane) * sublane
    return {
        "w_in": params["w_in"],                                   # (H, Din)
        "b_in": params["b_in"].reshape(-1, 1),                    # (H, 1)
        "w_fc1": params["w_fc1"],                                 # (H, H)
        "b_fc1": params["b_fc1"].reshape(-1, 1),                  # (H, 1)
        "w_out": jnp.pad(W_out, ((0, d_pad - d_out), (0, 0))),    # (Dpad, H)
        "b_out": jnp.pad(b_out, (0, d_pad - d_out)).reshape(-1, 1),
        "out_dim": int(d_out),
    }


def fn_net_forward(x, kparams, *, max_tile_b=2048):
    """x: (N, input_dim) float32.  kparams: output of prepare_params()."""
    N, Din = x.shape
    W_in, b_in = kparams["w_in"], kparams["b_in"]
    W_fc1, b_fc1 = kparams["w_fc1"], kparams["b_fc1"]
    W_out, b_out = kparams["w_out"], kparams["b_out"]
    H = W_in.shape[0]
    Dpad = W_out.shape[0]
    Dout = kparams["out_dim"]

    LANE = 128
    # Batch sits on the lane (last) axis: keep tile_b a multiple of 128.
    tile_b = min(pl.cdiv(N, LANE) * LANE, max_tile_b)
    n_tiles = pl.cdiv(N, tile_b)
    N_pad = n_tiles * tile_b

    xT = x.T                                           # (Din, N) — 2 rows, cheap
    if N_pad != N:
        xT = jnp.pad(xT, ((0, 0), (0, N_pad - N)))     # padded cols sliced off below

    rep = lambda shape: pl.BlockSpec(shape, lambda i: (0, 0))

    flops = 2 * N_pad * (Din * H + H * H + H * Dpad)
    bytes_accessed = 4 * (xT.size + W_in.size + b_in.size + W_fc1.size
                          + b_fc1.size + W_out.size + b_out.size
                          + Dpad * N_pad)
    cost = pl.CostEstimate(flops=flops,
                           transcendentals=2 * N_pad * H,
                           bytes_accessed=bytes_accessed)

    outT = pl.pallas_call(
        fn_net_kernel,
        out_shape=jax.ShapeDtypeStruct((Dpad, N_pad), jnp.float32),
        grid_spec=pltpu.PrefetchScalarGridSpec(
            num_scalar_prefetch=0,
            grid=(n_tiles,),
            in_specs=[
                pl.BlockSpec((Din, tile_b), lambda i: (0, i)),   # x^T tile
                rep((H, Din)),
                rep((H, 1)),
                rep((H, H)),
                rep((H, 1)),
                rep((Dpad, H)),
                rep((Dpad, 1)),
            ],
            out_specs=pl.BlockSpec((Dpad, tile_b), lambda i: (0, i)),
        ),
        compiler_params=pltpu.CompilerParams(
            dimension_semantics=("parallel",)),   # multi-tile batches shard TCs
        cost_estimate=cost,
    )(xT, W_in, b_in, W_fc1, b_fc1, W_out, b_out)

    # Tiny (Dout, N) slice + transpose back to (N, Dout).
    return outT[:Dout, :N].T


def init_params(key, input_dim, output_dim, hid_size):
    """Mimics nn.Linear's uniform(-1/sqrt(fan_in), 1/sqrt(fan_in)) init.
    PyTorch layout: weight (out_features, in_features), bias (out_features,)."""
    ks = jax.random.split(key, 6)

    def linear(kw, kb, fan_in, fan_out):
        bound = 1.0 / float(np.sqrt(fan_in))
        w = jax.random.uniform(kw, (fan_out, fan_in), jnp.float32, -bound, bound)
        b = jax.random.uniform(kb, (fan_out,), jnp.float32, -bound, bound)
        return w, b

    w_in, b_in = linear(ks[0], ks[1], input_dim, hid_size)
    w_fc1, b_fc1 = linear(ks[2], ks[3], hid_size, hid_size)
    w_out, b_out = linear(ks[4], ks[5], hid_size, output_dim)
    return {"w_in": w_in, "b_in": b_in,
            "w_fc1": w_fc1, "b_fc1": b_fc1,
            "w_out": w_out, "b_out": b_out}


def fn_net_reference(x, params):
    """Pure-JAX reference (PyTorch semantics), exact-f32 matmuls."""
    hp = jax.lax.Precision.HIGHEST
    h = jnp.tanh(jnp.dot(x, params["w_in"].T, precision=hp) + params["b_in"])
    h = jnp.tanh(jnp.dot(h, params["w_fc1"].T, precision=hp) + params["b_fc1"])
    return jnp.dot(h, params["w_out"].T, precision=hp) + params["b_out"]


if __name__ == "__main__":
    # 2D Ornstein-Uhlenbeck process: input_dim=2, output_dim=2, small hidden.
    input_dim, output_dim, hid_size = 2, 2, 32
    batch = 128

    key = jax.random.PRNGKey(0)
    k_params, k_x = jax.random.split(key)
    params = init_params(k_params, input_dim, output_dim, hid_size)
    kparams = prepare_params(params)        # hoisted, one-time padding/reshape

    x = jax.random.normal(k_x, (batch, input_dim), jnp.float32)
    y = fn_net_forward(x, kparams)          # N=128 -> tile_b=128 -> grid=(1,)
    y = jax.block_until_ready(y)

    y_ref = fn_net_reference(x, params)
    assert y.shape == (batch, output_dim)
    assert jnp.allclose(y, y_ref, atol=1e-5, rtol=1e-5), "mismatch vs reference"

    # Batch that is not a multiple of 128 (padded lanes sliced off).
    x_odd = jax.random.normal(jax.random.PRNGKey(1), (300, input_dim), jnp.float32)
    y_odd = jax.block_until_ready(fn_net_forward(x_odd, kparams))
    assert jnp.allclose(y_odd, fn_net_reference(x_odd, params), atol=1e-5, rtol=1e-5)

    # Exercise the multi-tile (grid > 1) path explicitly.
    y_multi = jax.block_until_ready(fn_net_forward(x_odd, kparams, max_tile_b=128))
    assert jnp.allclose(y_multi, fn_net_reference(x_odd, params), atol=1e-5, rtol=1e-5)

    print("KERNEL_OK")
</pallas_src>

<mosaic_0001>
module attributes {stable_mosaic.version = 11 : i64} {
  func.func @fn_net_kernel(%arg0: i32, %arg1: memref<2x128xf32, #tpu.memory_space<vmem>>, %arg2: memref<32x2xf32, #tpu.memory_space<vmem>>, %arg3: memref<32x1xf32, #tpu.memory_space<vmem>>, %arg4: memref<32x32xf32, #tpu.memory_space<vmem>>, %arg5: memref<32x1xf32, #tpu.memory_space<vmem>>, %arg6: memref<8x32xf32, #tpu.memory_space<vmem>>, %arg7: memref<8x1xf32, #tpu.memory_space<vmem>>, %arg8: memref<8x128xf32, #tpu.memory_space<vmem>>) attributes {dimension_semantics = [#tpu.dimension_semantics<parallel>], iteration_bounds = array<i64: 1>, scalar_prefetch = 0 : i64, scratch_operands = 0 : i64, tpu.core_type = #tpu.core_type<tc>, window_params = [{transform_indices = @transform_0, window_bounds = array<i64: 2, 128>}, {pipeline_mode = #tpu.pipeline_mode<synchronous>, transform_indices = @transform_1, window_bounds = array<i64: 32, 2>}, {pipeline_mode = #tpu.pipeline_mode<synchronous>, transform_indices = @transform_2, window_bounds = array<i64: 32, 1>}, {pipeline_mode = #tpu.pipeline_mode<synchronous>, transform_indices = @transform_3, window_bounds = array<i64: 32, 32>}, {pipeline_mode = #tpu.pipeline_mode<synchronous>, transform_indices = @transform_4, window_bounds = array<i64: 32, 1>}, {pipeline_mode = #tpu.pipeline_mode<synchronous>, transform_indices = @transform_5, window_bounds = array<i64: 8, 32>}, {pipeline_mode = #tpu.pipeline_mode<synchronous>, transform_indices = @transform_6, window_bounds = array<i64: 8, 1>}, {transform_indices = @transform_7, window_bounds = array<i64: 8, 128>}]} {
    %c0 = arith.constant 0 : index
    %c0_0 = arith.constant 0 : index
    %0 = vector.load %arg1[%c0, %c0_0] : memref<2x128xf32, #tpu.memory_space<vmem>>, vector<2x128xf32>
    %c0_1 = arith.constant 0 : index
    %c0_2 = arith.constant 0 : index
    %1 = vector.load %arg3[%c0_1, %c0_2] : memref<32x1xf32, #tpu.memory_space<vmem>>, vector<32x1xf32>
    %c0_3 = arith.constant 0 : index
    %c0_4 = arith.constant 0 : index
    %2 = vector.load %arg2[%c0_3, %c0_4] : memref<32x2xf32, #tpu.memory_space<vmem>>, vector<32x1xf32>
    %3 = vector.extract_strided_slice %0 {offsets = [0, 0], sizes = [1, 128], strides = [1, 1]} : vector<2x128xf32> to vector<1x128xf32>
    %4 = vector.broadcast %2 : vector<32x1xf32> to vector<32x128xf32>
    %5 = vector.broadcast %3 : vector<1x128xf32> to vector<32x128xf32>
    %6 = arith.mulf %4, %5 : vector<32x128xf32>
    %7 = vector.broadcast %1 : vector<32x1xf32> to vector<32x128xf32>
    %8 = arith.addf %7, %6 : vector<32x128xf32>
    %c0_5 = arith.constant 0 : index
    %c1 = arith.constant 1 : index
    %9 = vector.load %arg2[%c0_5, %c1] : memref<32x2xf32, #tpu.memory_space<vmem>>, vector<32x1xf32>
    %10 = vector.extract_strided_slice %0 {offsets = [1, 0], sizes = [1, 128], strides = [1, 1]} : vector<2x128xf32> to vector<1x128xf32>
    %11 = vector.broadcast %9 : vector<32x1xf32> to vector<32x128xf32>
    %12 = vector.broadcast %10 : vector<1x128xf32> to vector<32x128xf32>
    %13 = arith.mulf %11, %12 : vector<32x128xf32>
    %14 = arith.addf %8, %13 : vector<32x128xf32>
    %15 = math.tanh %14 : vector<32x128xf32>
    %c0_6 = arith.constant 0 : index
    %c0_7 = arith.constant 0 : index
    %16 = vector.load %arg4[%c0_6, %c0_7] : memref<32x32xf32, #tpu.memory_space<vmem>>, vector<32x32xf32>
    %cst = arith.constant dense<0.000000e+00> : vector<32x128xf32>
    %17 = tpu.matmul %16, %15, %cst {dimension_numbers = #tpu.dot_dimension_numbers<[1], [0], [0], [1], [0, 0, 1, 1], [], []>, precision = #tpu.contract_precision<fp32>} : vector<32x32xf32>, vector<32x128xf32>, vector<32x128xf32> -> vector<32x128xf32>
    %c0_8 = arith.constant 0 : index
    %c0_9 = arith.constant 0 : index
    %18 = vector.load %arg5[%c0_8, %c0_9] : memref<32x1xf32, #tpu.memory_space<vmem>>, vector<32x1xf32>
    %19 = vector.broadcast %18 : vector<32x1xf32> to vector<32x128xf32>
    %20 = arith.addf %17, %19 : vector<32x128xf32>
    %21 = math.tanh %20 : vector<32x128xf32>
    %c0_10 = arith.constant 0 : index
    %c0_11 = arith.constant 0 : index
    %22 = vector.load %arg6[%c0_10, %c0_11] : memref<8x32xf32, #tpu.memory_space<vmem>>, vector<8x32xf32>
    %cst_12 = arith.constant dense<0.000000e+00> : vector<8x128xf32>
    %23 = tpu.matmul %22, %21, %cst_12 {dimension_numbers = #tpu.dot_dimension_numbers<[1], [0], [0], [1], [0, 0, 1, 1], [], []>, precision = #tpu.contract_precision<fp32>} : vector<8x32xf32>, vector<32x128xf32>, vector<8x128xf32> -> vector<8x128xf32>
    %c0_13 = arith.constant 0 : index
    %c0_14 = arith.constant 0 : index
    %24 = vector.load %arg7[%c0_13, %c0_14] : memref<8x1xf32, #tpu.memory_space<vmem>>, vector<8x1xf32>
    %25 = vector.broadcast %24 : vector<8x1xf32> to vector<8x128xf32>
    %26 = arith.addf %23, %25 : vector<8x128xf32>
    %c0_15 = arith.constant 0 : index
    %c0_16 = arith.constant 0 : index
    %27 = vector.load %arg8[%c0_15, %c0_16] : memref<8x128xf32, #tpu.memory_space<vmem>>, vector<8x128xf32>
    tpu.vector_store %arg8[%c0_15, %c0_16], %26 {strides = array<i32>} : memref<8x128xf32, #tpu.memory_space<vmem>>, vector<8x128xf32>,
    return
  }
  func.func @transform_0(%arg0: i32) -> (i32, i32) {
    %c0_i32 = arith.constant 0 : i32
    %c0_i32_0 = arith.constant 0 : i32
    return %c0_i32, %arg0 : i32, i32
  }
  func.func @transform_1(%arg0: i32) -> (i32, i32) {
    %c0_i32 = arith.constant 0 : i32
    %c0_i32_0 = arith.constant 0 : i32
    %c0_i32_1 = arith.constant 0 : i32
    return %c0_i32, %c0_i32_0 : i32, i32
  }
  func.func @transform_2(%arg0: i32) -> (i32, i32) {
    %c0_i32 = arith.constant 0 : i32
    %c0_i32_0 = arith.constant 0 : i32
    %c0_i32_1 = arith.constant 0 : i32
    return %c0_i32, %c0_i32_0 : i32, i32
  }
  func.func @transform_3(%arg0: i32) -> (i32, i32) {
    %c0_i32 = arith.constant 0 : i32
    %c0_i32_0 = arith.constant 0 : i32
    %c0_i32_1 = arith.constant 0 : i32
    return %c0_i32, %c0_i32_0 : i32, i32
  }
  func.func @transform_4(%arg0: i32) -> (i32, i32) {
    %c0_i32 = arith.constant 0 : i32
    %c0_i32_0 = arith.constant 0 : i32
    %c0_i32_1 = arith.constant 0 : i32
    return %c0_i32, %c0_i32_0 : i32, i32
  }
  func.func @transform_5(%arg0: i32) -> (i32, i32) {
    %c0_i32 = arith.constant 0 : i32
    %c0_i32_0 = arith.constant 0 : i32
    %c0_i32_1 = arith.constant 0 : i32
    return %c0_i32, %c0_i32_0 : i32, i32
  }
  func.func @transform_6(%arg0: i32) -> (i32, i32) {
    %c0_i32 = arith.constant 0 : i32
    %c0_i32_0 = arith.constant 0 : i32
    %c0_i32_1 = arith.constant 0 : i32
    return %c0_i32, %c0_i32_0 : i32, i32
  }
  func.func @transform_7(%arg0: i32) -> (i32, i32) {
    %c0_i32 = arith.constant 0 : i32
    %c0_i32_0 = arith.constant 0 : i32
    return %c0_i32, %arg0 : i32, i32
  }
}

</mosaic_0001>

<bundles_post_ra>
// kernel: tpu_custom_call.1
= control target key start
LH: loop header
LB: loop body
LE: loop exit
PB: predicated region body
PF: predicated region fallthrough
CT: control target
= control target key end

     0   :  { %v1690_v2 = vmov 0   ;;  %s1891_s0 = inlined_call_operand.vmem [shape: f32[2,128], index: 0, kind: input, shape index: {}]   ;;  %s1892_s1 = inlined_call_operand.vmem [shape: f32[32,2], index: 1, kind: input, shape index: {}]   ;;  %s1893_s2 = inlined_call_operand.vmem [shape: f32[32,1], index: 2, kind: input, shape index: {}]   ;;  %s1894_s3 = inlined_call_operand.vmem [shape: f32[32,32], index: 3, kind: input, shape index: {}]   ;;  %s1895_s4 = inlined_call_operand.vmem [shape: f32[32,1], index: 4, kind: input, shape index: {}]   ;;  %s1896_s5 = inlined_call_operand.vmem [shape: f32[8,32], index: 5, kind: input, shape index: {}]   ;;  %s1897_s6 = inlined_call_operand.vmem [shape: f32[8,1], index: 6, kind: input, shape index: {}]   ;;  %s1898_s7 = inlined_call_operand.hbm [shape: f32[8,128], index: 7, kind: output, shape index: {}]  }
   0x1   :  { %v32_v0 = vld [vmem:[%s1892_s1] sm:$0xff]  ;;  %1643 = vset.pattern.permute.xlu1 %v1690_v2  ;;  %1642 = vset.pattern.permute.xlu0 %v1690_v2  ;;  %v33_v3 = vld [vmem:[%s1892_s1 + $0x8] sm:$0xff] }
   0x2   :  { %v28_v1 = vld [vmem:[%s1893_s2] sm:$0xff]  ;;  %38 = vperm.xlu0 %1642, %v32_v0   ;;  %v29_v4 = vld [vmem:[%s1893_s2 + $0x8] sm:$0xff] }
   0x3   :  { %66 = vperm.xlu1 %1643, %v28_v1  }
   0x4   :  { %12 = vsyncpa [#allocation3], 0  ;;  %v35_v5 = vld [vmem:[%s1892_s1 + $0x18] sm:$0xff]  ;;  %v1691_v6 = vmov 1   ;;  %v34_v7 = vld [vmem:[%s1892_s1 + $0x10] sm:$0xff]  ;;  %vm148_vm0 = vcmask 261120   ;;  %v56_v22 = vlaneseq }
   0x5   :  { %v30_v8 = vld [vmem:[%s1893_s2 + $0x10] sm:$0xff]  ;;  %v31_v9 = vld [vmem:[%s1893_s2 + $0x18] sm:$0xff]  ;;  %v120_v10 = vld [vmem:[%s1894_s3] sm:$0xff]  ;;  %vm1693_vm1 = vmmov 0  }
   0x6   :  { %43 = vperm.xlu0 %1642, %v33_v3   ;;  %v150_v11 = vsel %vm148_vm0, %v120_v10, 0  ;;  %v124_v17 = vld [vmem:[%s1895_s4] sm:$0xff]  ;;  %v125_v18 = vld [vmem:[%s1895_s4 + $0x8] sm:$0xff]  ;;  %v126_v19 = vld [vmem:[%s1895_s4 + $0x10] sm:$0xff]  ;;  %v57_v23 = vshrl.u32 %v56_v22, 7 }
   0x7   :  { %71 = vperm.xlu1 %1643, %v29_v4   ;;  %v1764_v12 = vand.u32 4294901760, %v150_v11  ;;  %v780_v20 = vld [vmem:[%s1897_s6] sm:$0xff]  ;;  %v127_v21 = vld [vmem:[%s1895_s4 + $0x18] sm:$0xff]  ;;  %v121_v52 = vld [vmem:[%s1894_s3 + $0x8] sm:$0xff] }
   0x8   :  { %v58_v24 = vsub.s32 0, %v57_v23  ;;  %v27_v27 = vld [vmem:[%s1891_s0] sm:$0x3]  ;;  %v106_v28 = vsub.s32 1, %v57_v23  ;;  %v122_v55 = vld [vmem:[%s1894_s3 + $0x10] sm:$0xff]  ;;  %v153_v57 = vsel %vm148_vm0, %v121_v52, 0 }
   0x9   :  { %v1767_v13 = vsub.f32 %v150_v11, %v1764_v12  ;;  %v156_v63 = vsel %vm148_vm0, %v122_v55, 0 }
   0xa   :  { %53 = vperm.xlu0 %1642, %v35_v5   ;;  %v59_v29 = vrot.slane %v27_v27, %v58_v24  ;;  %v107_v33 = vrot.slane %v27_v27, %v106_v28 }
   0xb   :  { %1644 = vset.pattern.permute.xlu1 %v1691_v6  ;;  %v232_v14 = vand.u32 4294901760, %v1767_v13 }
   0xc   :  { %93 = vperm.xlu1 %1644, %v33_v3  }
   0xd   :  { %v233_v15 = vsub.f32 %v1767_v13, %v232_v14 }
   0xe   :  { %1646 = vset.pattern.permute.xlu0 %v1691_v6 }
   0xf   :  { %89 = vperm.xlu0 %1646, %v32_v0   ;;  %v234_v16 = vand.u32 4294901760, %v233_v15  ;;  %v123_v0 = vld [vmem:[%s1894_s3 + $0x18] sm:$0xff] }
  0x10   :  { %1645 = vset.pattern.permute.xlu1 %v1690_v2 }
  0x11   :  { %48 = vperm.xlu1 %1645, %v34_v7   ;;  %1375 = vmatprep.mubr.f32.mxu0 %v234_v16 }
  0x13   :  { %97 = vperm.xlu0 %1646, %v34_v7  }
  0x15   :  { %76 = vperm.xlu1 %1645, %v30_v8  }
  0x17   :  { %1649 = vset.pattern.permute.xlu0 %v1690_v2 }
  0x18   :  { %135 = vperm.xlu0 %1649, %v125_v18  }
  0x19   :  { %81 = vperm.xlu1 %1645, %v31_v9  }
  0x1c   :  { %783 = vperm.xlu0 %1649, %v780_v20  }
  0x1d   :  { %1647 = vset.pattern.permute.xlu1 %v1691_v6  ;;  %v159_v6 = vsel %vm148_vm0, %v123_v0, 0 }
  0x1e   :  { %101 = vperm.xlu1 %1647, %v35_v5   ;;  %v1808_v5 = vand.u32 4294901760, %v156_v63  ;;  %v1817_v15 = vand.u32 4294901760, %v159_v6 }
  0x20   :  { %v251_v16 = vsub.f32 %v156_v63, %v1808_v5  ;;  %v261_v20 = vsub.f32 %v159_v6, %v1817_v15 }
  0x22   :  { %1648 = vset.pattern.permute.xlu1 %v1690_v2  ;;  %v1802_v2 = vand.u32 4294901760, %v153_v57  ;;  %v252_v22 = vand.u32 4294901760, %v251_v16  ;;  %v262_v28 = vand.u32 4294901760, %v261_v20 }
  0x23   :  { %130 = vperm.xlu1 %1648, %v124_v17  }
  0x24   :  { %v1814_v9 = vsub.f32 %v153_v57, %v1802_v2 }
  0x26   :  { %v242_v18 = vand.u32 4294901760, %v1814_v9 }
  0x27   :  { %140 = vperm.xlu1 %1648, %v126_v19  }
  0x2b   :  { %145 = vperm.xlu1 %1648, %v127_v21  }
  0x81   :  { %v39_v25 = vpop.permute.xlu0 %38 }
  0x82   :  { %v67_v26 = vpop.permute.xlu1 %66  ;;  %v60_v36 = vmul.f32 %v59_v29, %v39_v25  ;;  %v243_v25 = vsub.f32 %v1814_v9, %v242_v18 }
  0x84   :  { %v84_v41 = vadd.f32 %v67_v26, %v60_v36  ;;  %v263_v36 = vsub.f32 %v261_v20, %v262_v28 }
  0x85   :  { %v44_v30 = vpop.permute.xlu0 %43 }
  0x86   :  { %v72_v31 = vpop.permute.xlu1 %71  ;;  %v61_v32 = vmul.f32 %v59_v29, %v44_v30  ;;  %v253_v30 = vsub.f32 %v251_v16, %v252_v22 }
  0x88   :  { %v85_v37 = vadd.f32 %v72_v31, %v61_v32 }
  0x89   :  { %v54_v34 = vpop.permute.xlu0 %53 }
  0x8a   :  { %v63_v54 = vmul.f32 %v59_v29, %v54_v34  ;;  %v244_v34 = vand.u32 4294901760, %v243_v25 }
  0x8b   :  { %v94_v35 = vpop.permute.xlu1 %93 }
  0x8c   :  { %v109_v38 = vmul.f32 %v107_v33, %v94_v35 }
  0x8e   :  { %v113_v39 = vadd.f32 %v109_v38, %v85_v37  ;;  %v90_v40 = vpop.permute.xlu0 %89 }
  0x8f   :  { %v108_v42 = vmul.f32 %v107_v33, %v90_v40 }
  0x90   :  { %v49_v43 = vpop.permute.xlu1 %48  ;;  %1650 = vtanh.f32 %v113_v39  ;;  %v254_v39 = vand.u32 4294901760, %v253_v30 }
  0x91   :  { %v112_v44 = vadd.f32 %v108_v42, %v84_v41  ;;  %v62_v45 = vmul.f32 %v59_v29, %v49_v43  ;;  %v264_v41 = vand.u32 4294901760, %v263_v36 }
  0x92   :  { %v98_v46 = vpop.permute.xlu0 %97 }
  0x93   :  { %1652 = vtanh.f32 %v112_v44  ;;  %v110_v47 = vmul.f32 %v107_v33, %v98_v46 }
  0x94   :  { %v77_v48 = vpop.permute.xlu1 %76 }
  0x95   :  { %v86_v49 = vadd.f32 %v77_v48, %v62_v45 }
  0x97   :  { %v114_v50 = vadd.f32 %v110_v47, %v86_v49 }
  0x98   :  { %v82_v51 = vpop.permute.xlu1 %81 }
  0x99   :  { %1654 = vtanh.f32 %v114_v50  ;;  %v87_v59 = vadd.f32 %v82_v51, %v63_v54  ;;  %v136_v51 = vpop.permute.xlu0 %135 }
  0x9a   :  { %v1651_v53 = vpop.eup %1650 }
  0x9b   :  { %v165_v61 = vand.u32 4294901760, %v1651_v53 }
  0x9d   :  { %v102_v56 = vpop.permute.xlu1 %101  ;;  %v1653_v58 = vpop.eup %1652  ;;  %v279_v8 = vsub.f32 %v1651_v53, %v165_v61 }
  0x9e   :  { %v111_v60 = vmul.f32 %v107_v33, %v102_v56  ;;  %v162_v62 = vand.u32 4294901760, %v1653_v58 }
  0x9f   :  { %v280_v17 = vand.u32 4294901760, %v279_v8 }
  0xa0   :  { %v115_v1 = vadd.f32 %v111_v60, %v87_v59  ;;  %v1804_v3 = vpack.c.bf16 %v165_v61, %v162_v62  ;;  %v1806_v4 = vsub.f32 %v1653_v58, %v162_v62 }
  0xa1   :  { %v281_v23 = vsub.f32 %v279_v8, %v280_v17 }
  0xa2   :  { %1656 = vtanh.f32 %v115_v1  ;;  %1518 = vmatprep.subr.bf16.mxu0 %v1804_v3  ;;  %v273_v11 = vand.u32 4294901760, %v1806_v4  ;;  %v1533_v45 = vpack.c.bf16 %v279_v8, %v1806_v4  ;;  %v131_v49 = vpop.permute.xlu1 %130 }
  0xa3   :  { %v1655_v7 = vpop.eup %1654  ;;  %1520 = vmatpush3.bf16.msra.mxu0 %v1804_v3  ;;  %v282_v32 = vand.u32 4294901760, %v281_v23 }
  0xa4   :  { %v168_v10 = vand.u32 4294901760, %v1655_v7  ;;  %v274_v19 = vsub.f32 %v1806_v4, %v273_v11  ;;  %v1549_v47 = vpack.c.bf16 %v280_v17, %v273_v11 }
  0xa6   :  { %v286_v21 = vsub.f32 %v1655_v7, %v168_v10  ;;  %v275_v27 = vand.u32 4294901760, %v274_v19  ;;  %v141_v50 = vpop.permute.xlu1 %140 }
  0xa8   :  { %v287_v29 = vand.u32 4294901760, %v286_v21  ;;  %v1525_v35 = vpack.c.bf16 %v282_v32, %v275_v27 }
  0xaa   :  { %v288_v37 = vsub.f32 %v286_v21, %v287_v29  ;;  %v146_v57 = vpop.permute.xlu1 %145 }
  0xac   :  { %v1657_v24 = vpop.eup %1656  ;;  %v289_v42 = vand.u32 4294901760, %v288_v37 }
  0xad   :  { %v171_v26 = vand.u32 4294901760, %v1657_v24 }
  0xaf   :  { %v1521_v31 = vpack.c.bf16 %v171_v26, %v168_v10  ;;  %v293_v33 = vsub.f32 %v1657_v24, %v171_v26 }
  0xb1   :  { %1522 = vmatprep.subr.bf16.mxu0 %v1521_v31  ;;  %v294_v38 = vand.u32 4294901760, %v293_v33  ;;  %v1537_v46 = vpack.c.bf16 %v293_v33, %v286_v21 }
  0xb2   :  { %1524 = vmatpush3.bf16.msra.mxu0 %v1521_v31 }
  0xb3   :  { %1526 = vmatprep.subr.bf16.mxu0 %v1525_v35  ;;  %v295_v40 = vsub.f32 %v293_v33, %v294_v38  ;;  %v1553_v48 = vpack.c.bf16 %v294_v38, %v287_v29  ;;  %v784_v38 = vpop.permute.xlu0 %783 }
  0xb5   :  { %1376 = vmatmul.mubr.f32.vlgmr.msra.gmra.mrb[0].mxu0 %v244_v34  ;;  %v296_v43 = vand.u32 4294901760, %v295_v40 }
  0xb6   :  { %1528 = vmatpush3.bf16.msra.mxu0 %v1525_v35  ;;  %1378 = vmatprep.mubr.f32.mxu0 %v254_v39 }
  0xb7   :  { %v1529_v44 = vpack.c.bf16 %v296_v43, %v289_v42 }
  0xb9   :  { %1379 = vmatmul.mubr.f32.gmra.mrb[2].mxu0 %v264_v41  ;;  %1530 = vmatprep.subr.bf16.mxu0 %v1529_v44 }
  0xba   :  { %1532 = vmatpush3.bf16.msra.mxu0 %v1529_v44  ;;  %1389 = vmatprep.mubr.f32.mxu0 %v1764_v12 }
  0xbb   :  { %1534 = vmatprep.subr.bf16.mxu0 %v1533_v45 }
  0xbd   :  { %1390 = vmatmul.mubr.f32.vlgmr.msra.gmra.mrb[0].mxu0 %v1802_v2 }
  0xbe   :  { %1536 = vmatpush3.bf16.msra.mxu0 %v1533_v45  ;;  %1392 = vmatprep.mubr.f32.mxu0 %v1808_v5 }
  0xbf   :  { %1538 = vmatprep.subr.bf16.mxu0 %v1537_v46 }
  0xc1   :  { %1393 = vmatmul.mubr.f32.gmra.mrb[2].mxu0 %v1817_v15 }
  0xc2   :  { %1540 = vmatpush3.bf16.msra.mxu0 %v1537_v46  ;;  %1403 = vmatprep.mubr.f32.mxu0 %v1767_v13  ;;  %v1692_v13 = vmov 0.0|0.0  }
  0xc3   :  { %1542 = vmatprep.subr.bf16.mxu0 %v1804_v3  ;;  %1565 = vmatprep.subr.bf16.mxu1 %v1692_v13 }
  0xc5   :  { %1404 = vmatmul.mubr.f32.vlgmr.msra.gmra.mrb[0].mxu0 %v1814_v9 }
  0xc6   :  { %1544 = vmatpush3.bf16.msra.mxu0 %v1804_v3  ;;  %1406 = vmatprep.mubr.f32.mxu0 %v251_v16 }
  0xc7   :  { %1546 = vmatprep.subr.bf16.mxu0 %v1521_v31 }
  0xc9   :  { %1407 = vmatmul.mubr.f32.gmra.mrb[2].mxu0 %v261_v20 }
  0xca   :  { %1548 = vmatpush3.bf16.msra.mxu0 %v1521_v31  ;;  %1417 = vmatprep.mubr.f32.mxu0 %v232_v14  ;;  %v1694_v14 = vmov 0.0  }
  0xcb   :  { %1550 = vmatprep.subr.bf16.mxu0 %v1549_v47  ;;  %1459 = vmatprep.mubr.msk.f32.mxu1 %vm1693_vm1, %v1694_v14 }
  0xcd   :  { %1418 = vmatmul.mubr.f32.vlgmr.msra.gmra.mrb[0].mxu0 %v242_v18 }
  0xce   :  { %1552 = vmatpush3.bf16.msra.mxu0 %v1549_v47  ;;  %1420 = vmatprep.mubr.f32.mxu0 %v252_v22 }
  0xcf   :  { %1554 = vmatprep.subr.bf16.mxu0 %v1553_v48 }
  0xd1   :  { %1421 = vmatmul.mubr.f32.gmra.mrb[2].mxu0 %v262_v28 }
  0xd2   :  { %1556 = vmatpush3.bf16.msra.mxu0 %v1553_v48  ;;  %1431 = vmatprep.mubr.f32.mxu0 %v1764_v12 }
  0xd3   :  { %1558 = vmatprep.subr.bf16.mxu0 %v1804_v3 }
  0xd5   :  { %1432 = vmatmul.mubr.f32.vlgmr.msra.gmra.mrb[0].mxu0 %v1802_v2 }
  0xd6   :  { %1560 = vmatpush3.bf16.msra.mxu0 %v1804_v3  ;;  %1434 = vmatprep.mubr.f32.mxu0 %v1808_v5 }
  0xd7   :  { %1562 = vmatprep.subr.bf16.mxu0 %v1521_v31 }
  0xd9   :  { %1435 = vmatmul.mubr.f32.gmra.mrb[2].mxu0 %v1817_v15 }
  0xda   :  { %1564 = vmatpush3.bf16.msra.mxu0 %v1521_v31  ;;  %1445 = vmatprep.mubr.f32.mxu0 %v1764_v12  ;;  %v779_v12 = vld [vmem:[%s1896_s5] sm:$0xff]  ;;  %s1695_s5 = smov [#allocation2]  }
  0xdb   :  { %v787_v56 = vsel %vm148_vm0, %v779_v12, 0  ;;  %s1281_s10 = sshll.u32 %s1695_s5, 4  ;;  %s1282_s10 = int_to_ptr.vmem [resolvable:$true] %s1281_s10 }
  0xdc   :  { %v1852_v62 = vand.u32 4294901760, %v787_v56  ;;  %s1666_s11 = scalar_lea.vmem %s1282_s10, 128  ;;  %p1671_p1 = scmp.lt.s32.totalorder %s1282_s10, %s1282_s10 }
  0xdd   :  { %1446 = vmatmul.mubr.f32.vlgmr.msra.gmra.mrb[0].mxu0 %v1802_v2  ;;  %p1667_p0 = scmp.ne.s32.totalorder %s1282_s10, %s1666_s11  ;;  %p1672_p2 = scmp.lt.s32.totalorder %s1666_s11, %s1666_s11 }
  0xde   :  { %1448 = vmatprep.mubr.f32.mxu0 %v1808_v5  ;;  %v859_v63 = vsub.f32 %v787_v56, %v1852_v62 }
  0xdf   :  { %p1673_p3 = por %p1672_p2, %p1671_p1 }
  0xe0   :  { %v860_v3 = vand.u32 4294901760, %v859_v63 }
  0xe1   :  { %1449 = vmatmul.mubr.f32.gmra.mrb[2].mxu0 %v1817_v15  ;;  %p1674_p4 = pnand %p1673_p3, %p1667_p0 }
  0xe2   :  { %v861_v11 = vsub.f32 %v859_v63, %v860_v3 }
  0xe4   :  { %v862_v25 = vand.u32 4294901760, %v861_v11 }
 0x1b0   :  { %v1447_v52 = vpop.f32.mrb[0].mxu0 }
 0x1b1   :  { %v1601_v53 = vadd.f32 %v1447_v52, %v136_v51  ;;  %v753_v54 = vpop.f32.mrb[1].mxu0 }
 0x1b2   :  { %v1602_v55 = vadd.f32 %v753_v54, %v131_v49 }
 0x1b3   :  { %1658 = vtanh.f32 %v1601_v53 }
 0x1b4   :  { %1660 = vtanh.f32 %v1602_v55  ;;  %v1450_v58 = vpop.f32.mrb[2].mxu0 }
 0x1b5   :  { %v1603_v59 = vadd.f32 %v1450_v58, %v146_v57  ;;  %v765_v60 = vpop.f32.mrb[3].mxu0 }
 0x1b6   :  { %v1604_v61 = vadd.f32 %v765_v60, %v141_v50 }
 0x1b7   :  { %1662 = vtanh.f32 %v1603_v59 }
 0x1b8   :  { %1664 = vtanh.f32 %v1604_v61 }
 0x1bd   :  { %v1659_v0 = vpop.eup %1658 }
 0x1be   :  { %v1661_v1 = vpop.eup %1660  ;;  %v793_v2 = vand.u32 4294901760, %v1659_v0 }
 0x1bf   :  { %v790_v4 = vand.u32 4294901760, %v1661_v1 }
 0x1c0   :  { %v877_v5 = vsub.f32 %v1659_v0, %v793_v2 }
 0x1c1   :  { %v1663_v6 = vpop.eup %1662  ;;  %v1566_v7 = vpack.c.bf16 %v793_v2, %v790_v4  ;;  %v870_v8 = vsub.f32 %v1661_v1, %v790_v4 }
 0x1c2   :  { %v1665_v9 = vpop.eup %1664  ;;  %v799_v10 = vand.u32 4294901760, %v1663_v6  ;;  %v878_v15 = vand.u32 4294901760, %v877_v5 }
 0x1c3   :  { %1567 = vmatpush3.bf16.msra.mxu1 %v1566_v7  ;;  %v796_v16 = vand.u32 4294901760, %v1665_v9  ;;  %v871_v17 = vand.u32 4294901760, %v870_v8  ;;  %v1578_v18 = vpack.c.bf16 %v877_v5, %v870_v8 }
 0x1c4   :  { %1568 = vmatprep.subr.bf16.mxu1 %v1692_v13  ;;  %v891_v19 = vsub.f32 %v1663_v6, %v799_v10  ;;  %v879_v20 = vsub.f32 %v877_v5, %v878_v15 }
 0x1c5   :  { %v1569_v21 = vpack.c.bf16 %v799_v10, %v796_v16  ;;  %v884_v22 = vsub.f32 %v1665_v9, %v796_v16  ;;  %v872_v23 = vsub.f32 %v870_v8, %v871_v17  ;;  %v1590_v24 = vpack.c.bf16 %v878_v15, %v871_v17 }
 0x1c6   :  { %v880_v26 = vand.u32 4294901760, %v879_v20  ;;  %v892_v27 = vand.u32 4294901760, %v891_v19 }
 0x1c7   :  { %1570 = vmatpush3.bf16.msra.mxu1 %v1569_v21  ;;  %v873_v28 = vand.u32 4294901760, %v872_v23  ;;  %v885_v29 = vand.u32 4294901760, %v884_v22  ;;  %v1581_v30 = vpack.c.bf16 %v891_v19, %v884_v22 }
 0x1c8   :  { %1571 = vmatprep.subr.bf16.mxu1 %v1692_v13  ;;  %v893_v31 = vsub.f32 %v891_v19, %v892_v27 }
 0x1c9   :  { %v1572_v32 = vpack.c.bf16 %v880_v26, %v873_v28  ;;  %v886_v33 = vsub.f32 %v884_v22, %v885_v29  ;;  %v1593_v34 = vpack.c.bf16 %v892_v27, %v885_v29 }
 0x1ca   :  { %1460 = vmatmul.mubr.f32.vlgmr.msra.gmra.mrb[0].mxu1 %v862_v25  ;;  %v894_v35 = vand.u32 4294901760, %v893_v31 }
 0x1cb   :  { %1573 = vmatpush3.bf16.msra.mxu1 %v1572_v32  ;;  %v887_v36 = vand.u32 4294901760, %v886_v33  ;;  %1470 = vmatprep.mubr.msk.f32.mxu1 %vm1693_vm1, %v1694_v14 }
 0x1cc   :  { %1574 = vmatprep.subr.bf16.mxu1 %v1692_v13 }
 0x1cd   :  { %v1575_v37 = vpack.c.bf16 %v894_v35, %v887_v36 }
 0x1cf   :  { %1576 = vmatpush3.bf16.msra.mxu1 %v1575_v37 }
 0x1d0   :  { %1577 = vmatprep.subr.bf16.mxu1 %v1692_v13 }
 0x1d2   :  { %1471 = vmatmul.mubr.f32.vlgmr.msra.gmra.mrb[0].mxu1 %v1852_v62 }
 0x1d3   :  { %1579 = vmatpush3.bf16.msra.mxu1 %v1578_v18  ;;  %1481 = vmatprep.mubr.msk.f32.mxu1 %vm1693_vm1, %v1694_v14 }
 0x1d4   :  { %1580 = vmatprep.subr.bf16.mxu1 %v1692_v13 }
 0x1d7   :  { %1582 = vmatpush3.bf16.msra.mxu1 %v1581_v30 }
 0x1d8   :  { %1583 = vmatprep.subr.bf16.mxu1 %v1692_v13 }
 0x1da   :  { %1482 = vmatmul.mubr.f32.vlgmr.msra.gmra.mrb[0].mxu1 %v859_v63 }
 0x1db   :  { %1585 = vmatpush3.bf16.msra.mxu1 %v1566_v7  ;;  %1492 = vmatprep.mubr.msk.f32.mxu1 %vm1693_vm1, %v1694_v14 }
 0x1dc   :  { %1586 = vmatprep.subr.bf16.mxu1 %v1692_v13 }
 0x1df   :  { %1588 = vmatpush3.bf16.msra.mxu1 %v1569_v21 }
 0x1e0   :  { %1589 = vmatprep.subr.bf16.mxu1 %v1692_v13 }
 0x1e2   :  { %1493 = vmatmul.mubr.f32.vlgmr.msra.gmra.mrb[0].mxu1 %v860_v3 }
 0x1e3   :  { %1591 = vmatpush3.bf16.msra.mxu1 %v1590_v24  ;;  %1503 = vmatprep.mubr.msk.f32.mxu1 %vm1693_vm1, %v1694_v14 }
 0x1e4   :  { %1592 = vmatprep.subr.bf16.mxu1 %v1692_v13 }
 0x1e7   :  { %1594 = vmatpush3.bf16.msra.mxu1 %v1593_v34 }
 0x1e8   :  { %1595 = vmatprep.subr.bf16.mxu1 %v1692_v13 }
 0x1ea   :  { %1504 = vmatmul.mubr.f32.vlgmr.msra.gmra.mrb[0].mxu1 %v1852_v62 }
 0x1eb   :  { %1597 = vmatpush3.bf16.msra.mxu1 %v1566_v7  ;;  %1514 = vmatprep.mubr.msk.f32.mxu1 %vm1693_vm1, %v1694_v14 }
 0x1ec   :  { %1598 = vmatprep.subr.bf16.mxu1 %v1692_v13 }
 0x1ef   :  { %1600 = vmatpush3.bf16.msra.mxu1 %v1569_v21 }
 0x1f2   :  { %1515 = vmatmul.mubr.f32.vlgmr.msra.gmra.mrb[0].mxu1 %v1852_v62 }
 0x2c5   :  { %v1270_v39 = vpop.f32.mrb[0].mxu1 }
 0x2c6   :  { %v1605_v40 = vadd.f32 %v1270_v39, %v784_v38  ;;  %v1516_v41 = vpop.f32.mrb[1].mxu1 }
 0x2c8   :  { %1274 = vst [vmem:[#allocation2] sm:$0xff] %v1605_v40 }
 0x2c9   :  { %1677 = shalt.err (!%p1674_p4)
}
 0x2ca   :  { %s1678_s14 = scalar_lea.hbm %s1898_s7, 128 }
 0x2cb   :  { %p1679_p5 = scmp.ne.s32.totalorder %s1898_s7, %s1678_s14  ;;  %p1682_p6 = scmp.lt.u32.totalorder %s1678_s14, %s1898_s7 }
 0x2cd   :  { %p1684_p7 = pnand %p1682_p6, %p1679_p5 }
 0x2cf   :  { %1687 = shalt.err (!%p1684_p7)
}
 0x2d0   :  { %1284 = dma.vmem_to_hbm [thread:$0]  %s1282_s10, 128, %s1898_s7, [#allocation3]  }
 0x2d1   :  { %1688 = dma.done.wait [#allocation3], 128  }
 0x2d2   :  { %1689 = vsyncadd [#allocation3], 4294967168 }
 0x2d3   :  { %1288 = vsyncpa [#allocation3], 1 }

</bundles_post_ra>
